<compile_context>
chip_gen: v7x
topology: tpu7x:2x2x1
jax: 0.10.0
libtpu: 0.0.40
codegen_flags: <defaults>
</compile_context>

<pallas_src>
import numpy as np
import jax
import jax.numpy as jnp
from jax import lax
from jax.experimental import pallas as pl
from jax.experimental.pallas import tpu as pltpu


def _get_sinusoid_encoding_table(n_position: int, d_hid: int) -> np.ndarray:
    """Exact reproduction of the PyTorch sinusoid table (float32, shape (1, n_position, d_hid))."""
    def get_position_angle_vec(position):
        return [position / np.power(10000, 2 * (hid_j // 2) / d_hid) for hid_j in range(d_hid)]

    sinusoid_table = np.array(
        [get_position_angle_vec(pos_i) for pos_i in range(n_position)], dtype=np.float64
    )
    sinusoid_table[:, 0::2] = np.sin(sinusoid_table[:, 0::2])
    sinusoid_table[:, 1::2] = np.cos(sinusoid_table[:, 1::2])
    return sinusoid_table[None].astype(np.float32)  # (1, n_position, d_hid)


def _add_pos_kernel(x_ref, pos_ref, o_ref):
    # (tb, ts, D) + (1, ts, D): VPU broadcast over the leading batch dim.
    o_ref[...] = x_ref[...] + pos_ref[...]


_SUBLANE = 8


def _round_down(x: int, m: int) -> int:
    return (x // m) * m


def _pick_block_budget_bytes() -> int:
    """Per-block byte budget for x/out tiles, tuned per TPU generation."""
    # v7x: ~3.2 TB/s HBM, 64 MiB VMEM/TC  -> bigger blocks (live VMEM ~4.25x budget ≈ 17 MiB).
    # v5e/v6e: 1-2 MiB is already at the streaming-add roofline knee.
    try:
        info = pltpu.get_tpu_info()
        vmem_cap = getattr(info, "vmem_capacity_bytes", None)
        if isinstance(vmem_cap, int) and vmem_cap <= (64 << 20):
            return 4 << 20  # v7x-class chip
    except Exception:
        pass
    return 2 << 20


def positional_encoding(x: jax.Array, pos_table: jax.Array) -> jax.Array:
    """x: (B, S, D); pos_table: (1, n_position, D). Returns x + pos_table[:, :S, :] in x.dtype."""
    B, S, D = x.shape
    _, n_position, d_hid = pos_table.shape
    assert d_hid == D and S <= n_position

    # Pre-cast the (tiny) table once instead of upcasting every x tile in-kernel.
    # Output dtype == x.dtype (documented deviation from PyTorch's type promotion).
    pos_in = pos_table if pos_table.dtype == x.dtype else pos_table.astype(x.dtype)

    itemsize = jnp.dtype(x.dtype).itemsize
    block_budget = _pick_block_budget_bytes()

    # Rows (= sequence positions) per block across the batch multiplicity.
    row_bytes = D * itemsize
    rows_budget = max(_SUBLANE, block_budget // row_bytes)  # tb * ts rows per block

    if S >= _SUBLANE:
        # ts: multiple of 8 (sublane-dense), <= S, within the byte budget.
        ts_cap = _round_down(S, _SUBLANE)
        ts = min(ts_cap, max(_SUBLANE, _round_down(rows_budget, _SUBLANE)))
        pos_arg = pos_in  # first S rows windowed directly by the BlockSpec (no slice copy)
    else:
        # Tiny sequence: make S the full second-minor dim of the table window so the
        # (ts, D) block is legal without padding to 8 (few-hundred-byte slice, once).
        ts = S
        pos_arg = lax.slice(pos_in, (0, 0, 0), (1, S, D))

    tb = min(B, max(1, rows_budget // ts))

    nT = pl.cdiv(S, ts)
    nB = pl.cdiv(B, tb)
    # v7x has 2 TensorCores: guarantee >= 2 steps along a "parallel" axis when possible.
    if nT * nB == 1:
        if B >= 2:
            tb = (B + 1) // 2
            nB = pl.cdiv(B, tb)
        elif ts >= 2 * _SUBLANE:
            ts = max(_SUBLANE, _round_down((ts + 1) // 2, _SUBLANE))
            nT = pl.cdiv(S, ts)

    # Sequence axis OUTER, batch axis INNER: the pos block index (0, t, 0) is constant
    # across the inner batch steps, so Pallas skips re-fetching the table.
    grid = (nT, nB)

    cost = pl.CostEstimate(
        flops=B * S * D,
        transcendentals=0,
        bytes_accessed=2 * B * S * D * itemsize + S * D * jnp.dtype(pos_arg.dtype).itemsize,
    )

    # TODO(synk): input_output_aliases={0: 0} would reuse x's HBM buffer for the output.
    # That saves HBM *footprint* only (x is still read and out still written once each),
    # so it is not a bandwidth lever; omitted so x stays valid for callers.
    out = pl.pallas_call(
        _add_pos_kernel,
        out_shape=jax.ShapeDtypeStruct((B, S, D), x.dtype),
        grid_spec=pltpu.PrefetchScalarGridSpec(
            num_scalar_prefetch=0,
            grid=grid,
            in_specs=[
                pl.BlockSpec((tb, ts, D), lambda t, b: (b, t, 0)),  # x tile
                pl.BlockSpec((1, ts, D), lambda t, b: (0, t, 0)),   # pos tile (reused across b)
            ],
            out_specs=pl.BlockSpec((tb, ts, D), lambda t, b: (b, t, 0)),
        ),
        compiler_params=pltpu.CompilerParams(
            dimension_semantics=("parallel", "parallel"),
            # Live VMEM ≈ 4.25x block budget (<= ~17 MiB at 4 MiB blocks); 32 MiB is
            # within physical VMEM on v5e/v6e/v7x and raises v5e's 16 MiB scoped default.
            vmem_limit_bytes=32 << 20,
        ),
        cost_estimate=cost,
    )(x, pos_arg)

    return out


if __name__ == "__main__":
    d_hid = 32
    n_position = 200
    B, S = 2, 8

    # Deterministic "buffer" initialization, exactly as the module's __init__ would build it.
    pos_table = jnp.asarray(_get_sinusoid_encoding_table(n_position, d_hid))

    key = jax.random.PRNGKey(0)
    x = jax.random.normal(key, (B, S, d_hid), dtype=jnp.float32)

    out = positional_encoding(x, pos_table)
    out = jax.block_until_ready(out)

    # Reference check in plain JAX.
    ref = x + pos_table[:, :S, :]
    assert out.shape == (B, S, d_hid)
    np.testing.assert_allclose(np.asarray(out), np.asarray(ref), rtol=1e-6, atol=1e-6)

    print("KERNEL_OK")
</pallas_src>

<mosaic_0001>
module attributes {stable_mosaic.version = 11 : i64} {
  func.func @_add_pos_kernel(%arg0: i32, %arg1: i32, %arg2: memref<1x8x32xf32, #tpu.memory_space<vmem>>, %arg3: memref<1x8x32xf32, #tpu.memory_space<vmem>>, %arg4: memref<1x8x32xf32, #tpu.memory_space<vmem>>) attributes {dimension_semantics = [#tpu.dimension_semantics<parallel>, #tpu.dimension_semantics<parallel>], iteration_bounds = array<i64: 1, 2>, scalar_prefetch = 0 : i64, scratch_operands = 0 : i64, tpu.core_type = #tpu.core_type<tc>, window_params = [{transform_indices = @transform_0, window_bounds = array<i64: 1, 8, 32>}, {transform_indices = @transform_1, window_bounds = array<i64: 1, 8, 32>}, {transform_indices = @transform_2, window_bounds = array<i64: 1, 8, 32>}]} {
    %c0 = arith.constant 0 : index
    %c0_0 = arith.constant 0 : index
    %c0_1 = arith.constant 0 : index
    %0 = vector.load %arg2[%c0, %c0_0, %c0_1] : memref<1x8x32xf32, #tpu.memory_space<vmem>>, vector<1x8x32xf32>
    %c0_2 = arith.constant 0 : index
    %c0_3 = arith.constant 0 : index
    %c0_4 = arith.constant 0 : index
    %1 = vector.load %arg3[%c0_2, %c0_3, %c0_4] : memref<1x8x32xf32, #tpu.memory_space<vmem>>, vector<1x8x32xf32>
    %2 = arith.addf %0, %1 : vector<1x8x32xf32>
    %c0_5 = arith.constant 0 : index
    %c0_6 = arith.constant 0 : index
    %c0_7 = arith.constant 0 : index
    %3 = vector.load %arg4[%c0_5, %c0_6, %c0_7] : memref<1x8x32xf32, #tpu.memory_space<vmem>>, vector<1x8x32xf32>
    tpu.vector_store %arg4[%c0_5, %c0_6, %c0_7], %2 {strides = array<i32>} : memref<1x8x32xf32, #tpu.memory_space<vmem>>, vector<1x8x32xf32>,
    return
  }
  func.func @transform_0(%arg0: i32, %arg1: i32) -> (i32, i32, i32) {
    %c0_i32 = arith.constant 0 : i32
    %c0_i32_0 = arith.constant 0 : i32
    return %arg1, %arg0, %c0_i32 : i32, i32, i32
  }
  func.func @transform_1(%arg0: i32, %arg1: i32) -> (i32, i32, i32) {
    %c0_i32 = arith.constant 0 : i32
    %c0_i32_0 = arith.constant 0 : i32
    %c0_i32_1 = arith.constant 0 : i32
    return %c0_i32, %arg0, %c0_i32_0 : i32, i32, i32
  }
  func.func @transform_2(%arg0: i32, %arg1: i32) -> (i32, i32, i32) {
    %c0_i32 = arith.constant 0 : i32
    %c0_i32_0 = arith.constant 0 : i32
    return %arg1, %arg0, %c0_i32 : i32, i32, i32
  }
}

</mosaic_0001>

<bundles_post_ra>
// kernel: tpu_custom_call.1
= control target key start
LH: loop header
LB: loop body
LE: loop exit
PB: predicated region body
PF: predicated region fallthrough
CT: control target
= control target key end

     0   :  { %7 = vsyncpa [#allocation3], 0  ;;  %s565_s0 = inlined_call_operand.vmem [shape: f32[2,8,32], index: 0, kind: input, shape index: {}]   ;;  %s566_s1 = inlined_call_operand.vmem [shape: f32[1,200,32], index: 1, kind: input, shape index: {}]   ;;  %s567_s2 = inlined_call_operand.hbm [shape: f32[2,8,32], index: 2, kind: output, shape index: {}]  }
   0x1   :  { %9 = vsyncpa [#allocation3 + $0x1], 0  ;;  %s450_s9 = smov 0   ;;  %s452_s10 = smov 0  }
   0x2   :  { %s454_s11 = smov 0   ;;  %s456_s12 = smov 0  }
   0x3   :  { %s458_s13 = smov 0   ;;  %s460_s14 = smov 0  }
   0x4 LB: > { %s287_s15 = sadd.s32 4294967295, %s432_s14   ;;  %s288_s16 = sadd.s32 4294967294, %s432_s14   ;;  %s432_s14 = sphi %s460_s14, %s15_s14   ;;  %s428_s13 = sphi %s458_s13, %s574_s13   ;;  %s424_s12 = sphi %s456_s12, %s573_s12   ;;  %s420_s11 = sphi %s454_s11, %s572_s11   ;;  %s416_s10 = sphi %s452_s10, %s571_s10   ;;  %s412_s9 = sphi %s450_s9, %s570_s9  }
   0x5   : > { %s24_s17 = sadd.s32 1, %s428_s13  ;;  %s90_s18 = sadd.s32 1, %s420_s11 }
   0x6   : > { %p25_p0 = scmp.ge.s32.totalorder %s24_s17, 2  ;;  %p100_p1 = scmp.ne.s32.totalorder %s420_s11, %s416_s10 }
   0x7   : > { %p101_p2 = scmp.eq.s32.totalorder %s287_s15, 1  ;;  %p106_p3 = scmp.ne.s32.totalorder %s416_s10, %s412_s9 }
   0x8   : > { %s576_s17 = smov (%p25_p0, %s24_s17), 0  ;;  %p107_p5 = scmp.eq.s32.totalorder %s288_s16, 1 }
   0x9   : > { %p490_p4 = por %p101_p2, %p100_p1  ;;  %s85_s20 = ssub.s32 %s428_s13, %s576_s17 }
   0xa   : > { %p292_p6 = scmp.ge.s32.totalorder %s432_s14, 1  ;;  %p88_p7 = scmp.eq.s32.totalorder %s85_s20, 0 }
   0xb   : > { %p497_p8 = por %p107_p5, %p106_p3  ;;  %p142_p9 = scmp.lt.s32.totalorder %s432_s14, 3 }
   0xc   : > { %s503_s22 = scalar_select %p88_p7, %s420_s11, %s90_s18  }
   0xd   : > { %p143_p10 = pnand %p292_p6, %p142_p9 }
   0xe   : > { %s167_s23 = sand.u32 (!%p143_p10), 1, %s416_s10   ;;  %p170_p11 = scmp.lt.s32.totalorder (!%p143_p10), %s424_s12, 1  ;;  %v182_v0 = vld [vmem:[%s566_s1] sm:$0xff] (!%p143_p10)  ;;  %vm184_vm0 = vcmask (!%p143_p10), 261120  }
   0xf   : > { %146 = sbr.rel (%p143_p10) target bundleno = 43 (0x2b), region = 28  ;;  %s293_s24 = sshll.u32 (!%p143_p10), %s167_s23, 3 }
  0x10   : > { %s296_s26 = sshll.u32 (!%p143_p10), %s424_s12, 7  ;;  %s169_s30 = scalar_lea.vmem (!%p143_p10), [#allocation2], %s293_s24 }
  0x11   : > { %s201_s3 = sshll.u32 (!%p143_p10), %s169_s30, 4  ;;  %s187_s15 = scalar_lea.sflag (!%p143_p10), [#allocation3], %s167_s23  ;;  %s515_s3 = int_to_ptr.vmem [resolvable:$true] %s201_s3 }
  0x12   : > { %s354_s16 = scalar_lea.vmem (!%p143_p10), %s515_s3, 128  ;;  %s434_s18 = smov (!%p143_p10), [#allocation2]  }
  0x13   : > { %p355_p12 = scmp.ne.s32.totalorder (!%p143_p10), %s515_s3, %s354_s16  ;;  %s358_s20 = sshll.u32 (!%p143_p10), %s434_s18, 4  ;;  %s359_s20 = int_to_ptr.vmem [resolvable:$false] %s358_s20 }
  0x14   : > { %s360_s24 = scalar_lea.vmem (!%p143_p10), %s359_s20, 256  ;;  %p361_p1 = scmp.lt.s32.totalorder (!%p143_p10), %s515_s3, %s359_s20 }
  0x15   : > { %p356_p13 = pnand (!%p143_p10), %p355_p12, %p490_p4  ;;  %p362_p2 = scmp.lt.s32.totalorder (!%p143_p10), %s360_s24, %s354_s16 }
  0x16   : > { %s171_s25 = scalar_select %p170_p11, %s424_s12, 1 }
  0x17   : > { %s520_s12 = scalar_lea.hbm %s567_s2, %s296_s26  ;;  %p357_p0 = pneg %p356_p13 }
  0x18   : > { %s294_s27 = sshll.u32 %s171_s25, 3  ;;  %p363_p3 = por %p362_p2, %p361_p1 }
  0x19   : > { %s176_s6 = scalar_lea.vmem %s565_s0, %s294_s27 }
  0x1a   : > { %v181_v1 = vld [vmem:[%s176_s6] sm:$0xff]  ;;  %p364_p5 = pnand %p363_p3, %p357_p0 }
  0x1b   : > { %v183_v2 = vadd.f32 %v182_v0, %v181_v1 }
  0x1d   : > { %185 = vst.msk [vmem:[%s169_s30] sm:$0xff] %vm184_vm0, %v183_v2 }
  0x1e   : > { %367 = shalt.err (!%p364_p5)
}
  0x1f   : > { %s368_s23 = scalar_lea.hbm %s520_s12, 128  ;;  %s372_s27 = scalar_lea.hbm %s567_s2, 256 }
  0x20   : > { %p369_p6 = scmp.ne.s32.totalorder %s520_s12, %s368_s23  ;;  %p373_p10 = scmp.lt.u32.totalorder %s520_s12, %s567_s2 }
  0x21   : > { %p374_p11 = scmp.lt.u32.totalorder %s372_s27, %s368_s23  ;;  %p376_p13 = scmp.lt.u32.totalorder %s368_s23, %s520_s12 }
  0x22   : > { %p370_p7 = pnand %p369_p6, %p490_p4 }
  0x23   : > { %p375_p12 = por %p374_p11, %p373_p10 }
  0x24   : > { %p371_p9 = pneg %p370_p7 }
  0x25   : > { %p377_p0 = por %p376_p13, %p375_p12 }
  0x27   : > { %p378_p1 = pnand %p377_p0, %p371_p9 }
  0x29   : > { %381 = shalt.err (!%p378_p1)
}
  0x2a   : > { %299 = dma.vmem_to_hbm [thread:$0]  (%p490_p4), %s515_s3, 128, %s520_s12, %s187_s15  }
  0x2b PF: > { %p305_p2 = scmp.ge.s32.totalorder %s432_s14, 2  ;;  %s213_s30 = sand.u32 1, %s412_s9  }
  0x2c   : > { %s214_s4 = scalar_lea.sflag [#allocation3], %s213_s30 }
  0x2d   : > { %p302_p3 = pnand %p305_p2, %p497_p8 }
  0x2f   : > { %407 = dma.done.wait (!%p302_p3), %s214_s4, 128  }
  0x30   : > { %409 = vsyncadd (!%p302_p3), %s214_s4, 4294967168  ;;  %s15_s14 = sadd.s32 1, %s432_s14   ;;  %s570_s9 = smov %s416_s10 }
  0x31   : > { %p12_p5 = scmp.ge.s32.totalorder %s15_s14, 4   ;;  %s571_s10 = smov %s420_s11 }
  0x32   : > { %s572_s11 = smov %s503_s22  ;;  %s573_s12 = smov %s428_s13 }
  0x33   : > { %s574_s13 = smov %s576_s17  ;;  %14 = sbr.rel (!%p12_p5) target bundleno = 4 (0x4), region = 66 }
  0x3a   :  { %219 = vsyncpa [#allocation3], 1 }
  0x3b   :  { %221 = vsyncpa [#allocation3 + $0x1], 1 }

</bundles_post_ra>
